<compile_context>
chip_gen: v7x
topology: tpu7x:2x2x1
jax: 0.10.0
libtpu: 0.0.40
codegen_flags: <defaults>
</compile_context>

<pallas_src>
import math
import functools

import jax
import jax.numpy as jnp
from jax.experimental import pallas as pl
from jax.experimental.pallas import tpu as pltpu


def _attn_kernel(x_ref, w_attn_ref, b_attn_ref, w_proj_ref, b_proj_ref, o_ref,
                 *, n_head, seq_len, block_b, compute_dtype):
    # x_ref:      (block_b * T, C)   rows of several sequences, packed
    # w_attn_ref: (C, 3C)            already transposed (in_features first)
    # b_attn_ref: (1, 3C)
    # w_proj_ref: (C, C)             already transposed
    # b_proj_ref: (1, C)
    # o_ref:      (block_b * T, C)
    T = seq_len
    C = x_ref.shape[1]
    hd = C // n_head
    scale = jnp.float32(1.0 / math.sqrt(hd))
    neg_big = jnp.float32(-1e30)  # finite mask value: no inf-inf NaN hazard

    x = x_ref[...].astype(compute_dtype)  # no-op cast when dtypes already match

    # ---- QKV projection for the whole row block at once (packs MXU rows) ----
    qkv = jnp.dot(x, w_attn_ref[...].astype(compute_dtype),
                  preferred_element_type=jnp.float32)          # (rows, 3C) f32
    qkv = qkv + b_attn_ref[...].astype(jnp.float32)            # broadcast bias once

    q_all = qkv[:, 0 * C:1 * C] * scale    # fold 1/sqrt(hd) into q (rows*C elems)
    k_all = qkv[:, 1 * C:2 * C]
    v_all = qkv[:, 2 * C:3 * C]

    # Causal mask shared by every sequence / head in this block.
    row = jax.lax.broadcasted_iota(jnp.int32, (T, T), 0)
    col = jax.lax.broadcasted_iota(jnp.int32, (T, T), 1)
    causal = row >= col

    # ---- per-(sequence, head) attention with lane-contiguous 2-D dots ----
    seq_outs = []
    for b in range(block_b):
        r0 = b * T
        head_outs = []
        for h in range(n_head):
            c0 = h * hd
            q_h = q_all[r0:r0 + T, c0:c0 + hd].astype(compute_dtype)  # (T, hd)
            k_h = k_all[r0:r0 + T, c0:c0 + hd].astype(compute_dtype)  # (T, hd)
            v_h = v_all[r0:r0 + T, c0:c0 + hd].astype(compute_dtype)  # (T, hd)

            # q_h @ k_h^T without materializing a transpose: contract last dims.
            s = jax.lax.dot_general(
                q_h, k_h,
                dimension_numbers=(((1,), (1,)), ((), ())),
                preferred_element_type=jnp.float32)                   # (T, T)
            s = jnp.where(causal, s, neg_big)

            # Numerically-stable softmax; EUP reciprocal + multiply, no divide.
            m = jnp.max(s, axis=-1, keepdims=True)
            p = jnp.exp(s - m)
            denom = jnp.sum(p, axis=-1, keepdims=True)
            p = p * pl.reciprocal(denom, approx=True)

            y_h = jnp.dot(p.astype(compute_dtype), v_h,
                          preferred_element_type=jnp.float32)         # (T, hd)
            head_outs.append(y_h)
        seq_outs.append(jnp.concatenate(head_outs, axis=1))           # (T, C)
    y = seq_outs[0] if block_b == 1 else jnp.concatenate(seq_outs, axis=0)

    # ---- output projection over the whole row block ----
    out = jnp.dot(y.astype(compute_dtype), w_proj_ref[...].astype(compute_dtype),
                  preferred_element_type=jnp.float32)                 # (rows, C)
    out = out + b_proj_ref[...].astype(jnp.float32)
    o_ref[...] = out.astype(o_ref.dtype)


def _pick_block_b(B, T, target_rows=256):
    """Largest divisor of B whose row count (d*T) stays <= target and is
    sublane-friendly (multiple of 8, or the full batch)."""
    best = 1
    for d in range(1, B + 1):
        if B % d != 0:
            continue
        rows = d * T
        if rows <= max(target_rows, T) and (rows % 8 == 0 or d == B):
            best = d
    if (best * T) % 8 != 0 and best != B:
        best = B
    return best


def causal_self_attention(x, w_attn, b_attn, w_proj, b_proj, *, n_head,
                          compute_dtype=None, block_rows_target=256):
    """x: (B, T, C). Weights in PyTorch nn.Linear layout: W is (out, in)."""
    B, T, C = x.shape
    assert C % n_head == 0

    if compute_dtype is None:
        # Feed the MXU bf16 when the caller already runs in bf16 (v6e/v7x fast
        # path); keep exact f32 semantics for f32 inputs (matches the module).
        compute_dtype = jnp.bfloat16 if x.dtype == jnp.bfloat16 else jnp.float32

    # Pre-transpose weights once, HBM-side; kernel consumes them directly.
    w_attn_t = jnp.transpose(w_attn)          # (C, 3C)
    w_proj_t = jnp.transpose(w_proj)          # (C, C)
    b_attn2 = b_attn.reshape(1, 3 * C)
    b_proj2 = b_proj.reshape(1, C)

    block_b = _pick_block_b(B, T, block_rows_target)
    rows = block_b * T
    grid = (B // block_b,)

    # Flatten to (B*T, C): projections see a tall row-blocked LHS, and the
    # output tile is row-major lane-contiguous (lane-dense once C >= 128 as in
    # real GPT configs; C=32 in the toy test is unavoidably sub-128).
    x2 = x.reshape(B * T, C)

    kernel = functools.partial(_attn_kernel, n_head=n_head, seq_len=T,
                               block_b=block_b, compute_dtype=compute_dtype)

    # Scoped-VMEM budget: only override the default when the working set is
    # actually large (v5e default is 16 MiB). Never triggered at toy shapes.
    itemsize = jnp.dtype(x.dtype).itemsize
    est = (2 * 2 * rows * C * itemsize                          # x/out blocks, double-buffered
           + 2 * (C * 3 * C + 3 * C + C * C + C) * itemsize     # weights + biases
           + 8 * rows * 3 * C * 4                               # f32 intermediates
           + 4 * T * T * 4)                                     # score-tile temporaries
    compiler_kwargs = {}
    if est > 16 * 1024 * 1024:
        compiler_kwargs["vmem_limit_bytes"] = min(int(est * 2), 64 * 1024 * 1024)

    out2 = pl.pallas_call(
        kernel,
        out_shape=jax.ShapeDtypeStruct((B * T, C), x.dtype),
        grid_spec=pltpu.PrefetchScalarGridSpec(
            num_scalar_prefetch=0,
            grid=grid,
            in_specs=[
                pl.BlockSpec((rows, C), lambda i: (i, 0)),        # x rows
                pl.BlockSpec((C, 3 * C), lambda i: (0, 0)),        # W_attn.T
                pl.BlockSpec((1, 3 * C), lambda i: (0, 0)),        # b_attn
                pl.BlockSpec((C, C), lambda i: (0, 0)),            # W_proj.T
                pl.BlockSpec((1, C), lambda i: (0, 0)),            # b_proj
            ],
            out_specs=pl.BlockSpec((rows, C), lambda i: (i, 0)),
        ),
        compiler_params=pltpu.CompilerParams(
            dimension_semantics=("parallel",), **compiler_kwargs),
    )(x2, w_attn_t, b_attn2, w_proj_t, b_proj2)

    return out2.reshape(B, T, C)


def _reference(x, w_attn, b_attn, w_proj, b_proj, n_head):
    """Pure-JAX reference mirroring the PyTorch forward (dropout=0)."""
    B, T, C = x.shape
    hd = C // n_head
    qkv = x @ w_attn.T + b_attn
    q, k, v = jnp.split(qkv, 3, axis=2)

    def heads(t):  # (B, T, C) -> (B, H, T, hd)
        return t.reshape(B, T, n_head, hd).transpose(0, 2, 1, 3)

    q, k, v = heads(q), heads(k), heads(v)
    att = (q @ k.transpose(0, 1, 3, 2)) * (1.0 / math.sqrt(hd))
    mask = jnp.tril(jnp.ones((T, T)))[None, None]
    att = jnp.where(mask == 0, -jnp.inf, att)
    att = jax.nn.softmax(att, axis=-1)
    y = att @ v
    y = y.transpose(0, 2, 1, 3).reshape(B, T, C)
    return y @ w_proj.T + b_proj


if __name__ == "__main__":
    # Config: n_embd=32, n_head=4, block_size>=T, bias=True, dropout=0.0
    B, T, C, n_head = 2, 8, 32, 4

    key = jax.random.PRNGKey(0)
    k1, k2, k3, k4, k5 = jax.random.split(key, 5)
    x = jax.random.normal(k1, (B, T, C), dtype=jnp.float32)
    w_attn = jax.random.normal(k2, (3 * C, C), dtype=jnp.float32) * 0.02
    b_attn = jax.random.normal(k3, (3 * C,), dtype=jnp.float32) * 0.02
    w_proj = jax.random.normal(k4, (C, C), dtype=jnp.float32) * 0.02
    b_proj = jax.random.normal(k5, (C,), dtype=jnp.float32) * 0.02

    out = causal_self_attention(x, w_attn, b_attn, w_proj, b_proj,
                                n_head=n_head)
    out = jax.block_until_ready(out)

    ref = _reference(x, w_attn, b_attn, w_proj, b_proj, n_head)
    assert out.shape == (B, T, C)
    # Tolerance accounts for the approx EUP reciprocal in the softmax.
    assert jnp.allclose(out, ref, atol=2e-3, rtol=2e-3), "mismatch vs reference"

    print("KERNEL_OK")
</pallas_src>

<mosaic_0001>
module attributes {stable_mosaic.version = 11 : i64} {
  func.func @_attn_kernel(%arg0: i32, %arg1: memref<16x32xf32, #tpu.memory_space<vmem>>, %arg2: memref<32x96xf32, #tpu.memory_space<vmem>>, %arg3: memref<1x96xf32, #tpu.memory_space<vmem>>, %arg4: memref<32x32xf32, #tpu.memory_space<vmem>>, %arg5: memref<1x32xf32, #tpu.memory_space<vmem>>, %arg6: memref<16x32xf32, #tpu.memory_space<vmem>>) attributes {dimension_semantics = [#tpu.dimension_semantics<parallel>], iteration_bounds = array<i64: 1>, scalar_prefetch = 0 : i64, scratch_operands = 0 : i64, tpu.core_type = #tpu.core_type<tc>, window_params = [{transform_indices = @transform_0, window_bounds = array<i64: 16, 32>}, {pipeline_mode = #tpu.pipeline_mode<synchronous>, transform_indices = @transform_1, window_bounds = array<i64: 32, 96>}, {pipeline_mode = #tpu.pipeline_mode<synchronous>, transform_indices = @transform_2, window_bounds = array<i64: 1, 96>}, {pipeline_mode = #tpu.pipeline_mode<synchronous>, transform_indices = @transform_3, window_bounds = array<i64: 32, 32>}, {pipeline_mode = #tpu.pipeline_mode<synchronous>, transform_indices = @transform_4, window_bounds = array<i64: 1, 32>}, {transform_indices = @transform_5, window_bounds = array<i64: 16, 32>}]} {
    %c0 = arith.constant 0 : index
    %c0_0 = arith.constant 0 : index
    %0 = vector.load %arg1[%c0, %c0_0] : memref<16x32xf32, #tpu.memory_space<vmem>>, vector<16x32xf32>
    %c0_1 = arith.constant 0 : index
    %c0_2 = arith.constant 0 : index
    %1 = vector.load %arg2[%c0_1, %c0_2] : memref<32x96xf32, #tpu.memory_space<vmem>>, vector<32x96xf32>
    %cst = arith.constant dense<0.000000e+00> : vector<16x96xf32>
    %2 = tpu.matmul %0, %1, %cst {dimension_numbers = #tpu.dot_dimension_numbers<[1], [0], [0], [1], [0, 0, 1, 1], [], []>} : vector<16x32xf32>, vector<32x96xf32>, vector<16x96xf32> -> vector<16x96xf32>
    %c0_3 = arith.constant 0 : index
    %c0_4 = arith.constant 0 : index
    %3 = vector.load %arg3[%c0_3, %c0_4] : memref<1x96xf32, #tpu.memory_space<vmem>>, vector<1x96xf32>
    %4 = vector.broadcast %3 : vector<1x96xf32> to vector<16x96xf32>
    %5 = arith.addf %2, %4 : vector<16x96xf32>
    %6 = vector.extract_strided_slice %5 {offsets = [0, 0], sizes = [16, 32], strides = [1, 1]} : vector<16x96xf32> to vector<16x32xf32>
    %cst_5 = arith.constant 0.353553385 : f32
    %7 = vector.broadcast %cst_5 : f32 to vector<16x32xf32>
    %8 = arith.mulf %6, %7 : vector<16x32xf32>
    %9 = vector.extract_strided_slice %5 {offsets = [0, 32], sizes = [16, 32], strides = [1, 1]} : vector<16x96xf32> to vector<16x32xf32>
    %10 = vector.extract_strided_slice %5 {offsets = [0, 64], sizes = [16, 32], strides = [1, 1]} : vector<16x96xf32> to vector<16x32xf32>
    %11 = tpu.iota {dimensions = array<i32: 0>} : vector<8x8xi32>
    %12 = tpu.iota {dimensions = array<i32: 1>} : vector<8x8xi32>
    %13 = arith.cmpi sge, %11, %12 : vector<8x8xi32>
    %14 = vector.extract_strided_slice %8 {offsets = [0, 0], sizes = [8, 8], strides = [1, 1]} : vector<16x32xf32> to vector<8x8xf32>
    %15 = vector.extract_strided_slice %9 {offsets = [0, 0], sizes = [8, 8], strides = [1, 1]} : vector<16x32xf32> to vector<8x8xf32>
    %16 = vector.extract_strided_slice %10 {offsets = [0, 0], sizes = [8, 8], strides = [1, 1]} : vector<16x32xf32> to vector<8x8xf32>
    %cst_6 = arith.constant dense<0.000000e+00> : vector<8x8xf32>
    %17 = tpu.matmul %14, %15, %cst_6 {dimension_numbers = #tpu.dot_dimension_numbers<[1], [1], [0], [0], [0, 0, 1, 0], [], []>} : vector<8x8xf32>, vector<8x8xf32>, vector<8x8xf32> -> vector<8x8xf32>
    %cst_7 = arith.constant -1.000000e+30 : f32
    %18 = vector.broadcast %cst_7 : f32 to vector<8x8xf32>
    %19 = arith.select %13, %17, %18 : vector<8x8xi1>, vector<8x8xf32>
    %cst_8 = arith.constant dense<0xFF800000> : vector<8xf32>
    %20 = vector.multi_reduction <maximumf>, %19, %cst_8 [1] : vector<8x8xf32> to vector<8xf32>
    %21 = vector.shape_cast %20 : vector<8xf32> to vector<8x1xf32>
    %22 = vector.broadcast %21 : vector<8x1xf32> to vector<8x8xf32>
    %23 = arith.subf %19, %22 : vector<8x8xf32>
    %24 = math.exp %23 : vector<8x8xf32>
    %cst_9 = arith.constant dense<0.000000e+00> : vector<8xf32>
    %25 = vector.multi_reduction <add>, %24, %cst_9 [1] : vector<8x8xf32> to vector<8xf32>
    %26 = vector.shape_cast %25 : vector<8xf32> to vector<8x1xf32>
    %27 = tpu.reciprocal %26 {approx = true} : vector<8x1xf32> -> vector<8x1xf32>
    %28 = vector.broadcast %27 : vector<8x1xf32> to vector<8x8xf32>
    %29 = arith.mulf %24, %28 : vector<8x8xf32>
    %cst_10 = arith.constant dense<0.000000e+00> : vector<8x8xf32>
    %30 = tpu.matmul %29, %16, %cst_10 {dimension_numbers = #tpu.dot_dimension_numbers<[1], [0], [0], [1], [0, 0, 1, 1], [], []>} : vector<8x8xf32>, vector<8x8xf32>, vector<8x8xf32> -> vector<8x8xf32>
    %31 = vector.extract_strided_slice %8 {offsets = [0, 8], sizes = [8, 8], strides = [1, 1]} : vector<16x32xf32> to vector<8x8xf32>
    %32 = vector.extract_strided_slice %9 {offsets = [0, 8], sizes = [8, 8], strides = [1, 1]} : vector<16x32xf32> to vector<8x8xf32>
    %33 = vector.extract_strided_slice %10 {offsets = [0, 8], sizes = [8, 8], strides = [1, 1]} : vector<16x32xf32> to vector<8x8xf32>
    %cst_11 = arith.constant dense<0.000000e+00> : vector<8x8xf32>
    %34 = tpu.matmul %31, %32, %cst_11 {dimension_numbers = #tpu.dot_dimension_numbers<[1], [1], [0], [0], [0, 0, 1, 0], [], []>} : vector<8x8xf32>, vector<8x8xf32>, vector<8x8xf32> -> vector<8x8xf32>
    %cst_12 = arith.constant -1.000000e+30 : f32
    %35 = vector.broadcast %cst_12 : f32 to vector<8x8xf32>
    %36 = arith.select %13, %34, %35 : vector<8x8xi1>, vector<8x8xf32>
    %cst_13 = arith.constant dense<0xFF800000> : vector<8xf32>
    %37 = vector.multi_reduction <maximumf>, %36, %cst_13 [1] : vector<8x8xf32> to vector<8xf32>
    %38 = vector.shape_cast %37 : vector<8xf32> to vector<8x1xf32>
    %39 = vector.broadcast %38 : vector<8x1xf32> to vector<8x8xf32>
    %40 = arith.subf %36, %39 : vector<8x8xf32>
    %41 = math.exp %40 : vector<8x8xf32>
    %cst_14 = arith.constant dense<0.000000e+00> : vector<8xf32>
    %42 = vector.multi_reduction <add>, %41, %cst_14 [1] : vector<8x8xf32> to vector<8xf32>
    %43 = vector.shape_cast %42 : vector<8xf32> to vector<8x1xf32>
    %44 = tpu.reciprocal %43 {approx = true} : vector<8x1xf32> -> vector<8x1xf32>
    %45 = vector.broadcast %44 : vector<8x1xf32> to vector<8x8xf32>
    %46 = arith.mulf %41, %45 : vector<8x8xf32>
    %cst_15 = arith.constant dense<0.000000e+00> : vector<8x8xf32>
    %47 = tpu.matmul %46, %33, %cst_15 {dimension_numbers = #tpu.dot_dimension_numbers<[1], [0], [0], [1], [0, 0, 1, 1], [], []>} : vector<8x8xf32>, vector<8x8xf32>, vector<8x8xf32> -> vector<8x8xf32>
    %48 = vector.extract_strided_slice %8 {offsets = [0, 16], sizes = [8, 8], strides = [1, 1]} : vector<16x32xf32> to vector<8x8xf32>
    %49 = vector.extract_strided_slice %9 {offsets = [0, 16], sizes = [8, 8], strides = [1, 1]} : vector<16x32xf32> to vector<8x8xf32>
    %50 = vector.extract_strided_slice %10 {offsets = [0, 16], sizes = [8, 8], strides = [1, 1]} : vector<16x32xf32> to vector<8x8xf32>
    %cst_16 = arith.constant dense<0.000000e+00> : vector<8x8xf32>
    %51 = tpu.matmul %48, %49, %cst_16 {dimension_numbers = #tpu.dot_dimension_numbers<[1], [1], [0], [0], [0, 0, 1, 0], [], []>} : vector<8x8xf32>, vector<8x8xf32>, vector<8x8xf32> -> vector<8x8xf32>
    %cst_17 = arith.constant -1.000000e+30 : f32
    %52 = vector.broadcast %cst_17 : f32 to vector<8x8xf32>
    %53 = arith.select %13, %51, %52 : vector<8x8xi1>, vector<8x8xf32>
    %cst_18 = arith.constant dense<0xFF800000> : vector<8xf32>
    %54 = vector.multi_reduction <maximumf>, %53, %cst_18 [1] : vector<8x8xf32> to vector<8xf32>
    %55 = vector.shape_cast %54 : vector<8xf32> to vector<8x1xf32>
    %56 = vector.broadcast %55 : vector<8x1xf32> to vector<8x8xf32>
    %57 = arith.subf %53, %56 : vector<8x8xf32>
    %58 = math.exp %57 : vector<8x8xf32>
    %cst_19 = arith.constant dense<0.000000e+00> : vector<8xf32>
    %59 = vector.multi_reduction <add>, %58, %cst_19 [1] : vector<8x8xf32> to vector<8xf32>
    %60 = vector.shape_cast %59 : vector<8xf32> to vector<8x1xf32>
    %61 = tpu.reciprocal %60 {approx = true} : vector<8x1xf32> -> vector<8x1xf32>
    %62 = vector.broadcast %61 : vector<8x1xf32> to vector<8x8xf32>
    %63 = arith.mulf %58, %62 : vector<8x8xf32>
    %cst_20 = arith.constant dense<0.000000e+00> : vector<8x8xf32>
    %64 = tpu.matmul %63, %50, %cst_20 {dimension_numbers = #tpu.dot_dimension_numbers<[1], [0], [0], [1], [0, 0, 1, 1], [], []>} : vector<8x8xf32>, vector<8x8xf32>, vector<8x8xf32> -> vector<8x8xf32>
    %65 = vector.extract_strided_slice %8 {offsets = [0, 24], sizes = [8, 8], strides = [1, 1]} : vector<16x32xf32> to vector<8x8xf32>
    %66 = vector.extract_strided_slice %9 {offsets = [0, 24], sizes = [8, 8], strides = [1, 1]} : vector<16x32xf32> to vector<8x8xf32>
    %67 = vector.extract_strided_slice %10 {offsets = [0, 24], sizes = [8, 8], strides = [1, 1]} : vector<16x32xf32> to vector<8x8xf32>
    %cst_21 = arith.constant dense<0.000000e+00> : vector<8x8xf32>
    %68 = tpu.matmul %65, %66, %cst_21 {dimension_numbers = #tpu.dot_dimension_numbers<[1], [1], [0], [0], [0, 0, 1, 0], [], []>} : vector<8x8xf32>, vector<8x8xf32>, vector<8x8xf32> -> vector<8x8xf32>
    %cst_22 = arith.constant -1.000000e+30 : f32
    %69 = vector.broadcast %cst_22 : f32 to vector<8x8xf32>
    %70 = arith.select %13, %68, %69 : vector<8x8xi1>, vector<8x8xf32>
    %cst_23 = arith.constant dense<0xFF800000> : vector<8xf32>
    %71 = vector.multi_reduction <maximumf>, %70, %cst_23 [1] : vector<8x8xf32> to vector<8xf32>
    %72 = vector.shape_cast %71 : vector<8xf32> to vector<8x1xf32>
    %73 = vector.broadcast %72 : vector<8x1xf32> to vector<8x8xf32>
    %74 = arith.subf %70, %73 : vector<8x8xf32>
    %75 = math.exp %74 : vector<8x8xf32>
    %cst_24 = arith.constant dense<0.000000e+00> : vector<8xf32>
    %76 = vector.multi_reduction <add>, %75, %cst_24 [1] : vector<8x8xf32> to vector<8xf32>
    %77 = vector.shape_cast %76 : vector<8xf32> to vector<8x1xf32>
    %78 = tpu.reciprocal %77 {approx = true} : vector<8x1xf32> -> vector<8x1xf32>
    %79 = vector.broadcast %78 : vector<8x1xf32> to vector<8x8xf32>
    %80 = arith.mulf %75, %79 : vector<8x8xf32>
    %cst_25 = arith.constant dense<0.000000e+00> : vector<8x8xf32>
    %81 = tpu.matmul %80, %67, %cst_25 {dimension_numbers = #tpu.dot_dimension_numbers<[1], [0], [0], [1], [0, 0, 1, 1], [], []>} : vector<8x8xf32>, vector<8x8xf32>, vector<8x8xf32> -> vector<8x8xf32>
    %82 = tpu.concatenate %30, %47, %64, %81 in 1 : vector<8x8xf32>, vector<8x8xf32>, vector<8x8xf32>, vector<8x8xf32> -> vector<8x32xf32>
    %83 = vector.extract_strided_slice %8 {offsets = [8, 0], sizes = [8, 8], strides = [1, 1]} : vector<16x32xf32> to vector<8x8xf32>
    %84 = vector.extract_strided_slice %9 {offsets = [8, 0], sizes = [8, 8], strides = [1, 1]} : vector<16x32xf32> to vector<8x8xf32>
    %85 = vector.extract_strided_slice %10 {offsets = [8, 0], sizes = [8, 8], strides = [1, 1]} : vector<16x32xf32> to vector<8x8xf32>
    %cst_26 = arith.constant dense<0.000000e+00> : vector<8x8xf32>
    %86 = tpu.matmul %83, %84, %cst_26 {dimension_numbers = #tpu.dot_dimension_numbers<[1], [1], [0], [0], [0, 0, 1, 0], [], []>} : vector<8x8xf32>, vector<8x8xf32>, vector<8x8xf32> -> vector<8x8xf32>
    %cst_27 = arith.constant -1.000000e+30 : f32
    %87 = vector.broadcast %cst_27 : f32 to vector<8x8xf32>
    %88 = arith.select %13, %86, %87 : vector<8x8xi1>, vector<8x8xf32>
    %cst_28 = arith.constant dense<0xFF800000> : vector<8xf32>
    %89 = vector.multi_reduction <maximumf>, %88, %cst_28 [1] : vector<8x8xf32> to vector<8xf32>
    %90 = vector.shape_cast %89 : vector<8xf32> to vector<8x1xf32>
    %91 = vector.broadcast %90 : vector<8x1xf32> to vector<8x8xf32>
    %92 = arith.subf %88, %91 : vector<8x8xf32>
    %93 = math.exp %92 : vector<8x8xf32>
    %cst_29 = arith.constant dense<0.000000e+00> : vector<8xf32>
    %94 = vector.multi_reduction <add>, %93, %cst_29 [1] : vector<8x8xf32> to vector<8xf32>
    %95 = vector.shape_cast %94 : vector<8xf32> to vector<8x1xf32>
    %96 = tpu.reciprocal %95 {approx = true} : vector<8x1xf32> -> vector<8x1xf32>
    %97 = vector.broadcast %96 : vector<8x1xf32> to vector<8x8xf32>
    %98 = arith.mulf %93, %97 : vector<8x8xf32>
    %cst_30 = arith.constant dense<0.000000e+00> : vector<8x8xf32>
    %99 = tpu.matmul %98, %85, %cst_30 {dimension_numbers = #tpu.dot_dimension_numbers<[1], [0], [0], [1], [0, 0, 1, 1], [], []>} : vector<8x8xf32>, vector<8x8xf32>, vector<8x8xf32> -> vector<8x8xf32>
    %100 = vector.extract_strided_slice %8 {offsets = [8, 8], sizes = [8, 8], strides = [1, 1]} : vector<16x32xf32> to vector<8x8xf32>
    %101 = vector.extract_strided_slice %9 {offsets = [8, 8], sizes = [8, 8], strides = [1, 1]} : vector<16x32xf32> to vector<8x8xf32>
    %102 = vector.extract_strided_slice %10 {offsets = [8, 8], sizes = [8, 8], strides = [1, 1]} : vector<16x32xf32> to vector<8x8xf32>
    %cst_31 = arith.constant dense<0.000000e+00> : vector<8x8xf32>
    %103 = tpu.matmul %100, %101, %cst_31 {dimension_numbers = #tpu.dot_dimension_numbers<[1], [1], [0], [0], [0, 0, 1, 0], [], []>} : vector<8x8xf32>, vector<8x8xf32>, vector<8x8xf32> -> vector<8x8xf32>
    %cst_32 = arith.constant -1.000000e+30 : f32
    %104 = vector.broadcast %cst_32 : f32 to vector<8x8xf32>
    %105 = arith.select %13, %103, %104 : vector<8x8xi1>, vector<8x8xf32>
    %cst_33 = arith.constant dense<0xFF800000> : vector<8xf32>
    %106 = vector.multi_reduction <maximumf>, %105, %cst_33 [1] : vector<8x8xf32> to vector<8xf32>
    %107 = vector.shape_cast %106 : vector<8xf32> to vector<8x1xf32>
    %108 = vector.broadcast %107 : vector<8x1xf32> to vector<8x8xf32>
    %109 = arith.subf %105, %108 : vector<8x8xf32>
    %110 = math.exp %109 : vector<8x8xf32>
    %cst_34 = arith.constant dense<0.000000e+00> : vector<8xf32>
    %111 = vector.multi_reduction <add>, %110, %cst_34 [1] : vector<8x8xf32> to vector<8xf32>
    %112 = vector.shape_cast %111 : vector<8xf32> to vector<8x1xf32>
    %113 = tpu.reciprocal %112 {approx = true} : vector<8x1xf32> -> vector<8x1xf32>
    %114 = vector.broadcast %113 : vector<8x1xf32> to vector<8x8xf32>
    %115 = arith.mulf %110, %114 : vector<8x8xf32>
    %cst_35 = arith.constant dense<0.000000e+00> : vector<8x8xf32>
    %116 = tpu.matmul %115, %102, %cst_35 {dimension_numbers = #tpu.dot_dimension_numbers<[1], [0], [0], [1], [0, 0, 1, 1], [], []>} : vector<8x8xf32>, vector<8x8xf32>, vector<8x8xf32> -> vector<8x8xf32>
    %117 = vector.extract_strided_slice %8 {offsets = [8, 16], sizes = [8, 8], strides = [1, 1]} : vector<16x32xf32> to vector<8x8xf32>
    %118 = vector.extract_strided_slice %9 {offsets = [8, 16], sizes = [8, 8], strides = [1, 1]} : vector<16x32xf32> to vector<8x8xf32>
    %119 = vector.extract_strided_slice %10 {offsets = [8, 16], sizes = [8, 8], strides = [1, 1]} : vector<16x32xf32> to vector<8x8xf32>
    %cst_36 = arith.constant dense<0.000000e+00> : vector<8x8xf32>
    %120 = tpu.matmul %117, %118, %cst_36 {dimension_numbers = #tpu.dot_dimension_numbers<[1], [1], [0], [0], [0, 0, 1, 0], [], []>} : vector<8x8xf32>, vector<8x8xf32>, vector<8x8xf32> -> vector<8x8xf32>
    %cst_37 = arith.constant -1.000000e+30 : f32
    %121 = vector.broadcast %cst_37 : f32 to vector<8x8xf32>
    %122 = arith.select %13, %120, %121 : vector<8x8xi1>, vector<8x8xf32>
    %cst_38 = arith.constant dense<0xFF800000> : vector<8xf32>
    %123 = vector.multi_reduction <maximumf>, %122, %cst_38 [1] : vector<8x8xf32> to vector<8xf32>
    %124 = vector.shape_cast %123 : vector<8xf32> to vector<8x1xf32>
    %125 = vector.broadcast %124 : vector<8x1xf32> to vector<8x8xf32>
    %126 = arith.subf %122, %125 : vector<8x8xf32>
    %127 = math.exp %126 : vector<8x8xf32>
    %cst_39 = arith.constant dense<0.000000e+00> : vector<8xf32>
    %128 = vector.multi_reduction <add>, %127, %cst_39 [1] : vector<8x8xf32> to vector<8xf32>
    %129 = vector.shape_cast %128 : vector<8xf32> to vector<8x1xf32>
    %130 = tpu.reciprocal %129 {approx = true} : vector<8x1xf32> -> vector<8x1xf32>
    %131 = vector.broadcast %130 : vector<8x1xf32> to vector<8x8xf32>
    %132 = arith.mulf %127, %131 : vector<8x8xf32>
    %cst_40 = arith.constant dense<0.000000e+00> : vector<8x8xf32>
    %133 = tpu.matmul %132, %119, %cst_40 {dimension_numbers = #tpu.dot_dimension_numbers<[1], [0], [0], [1], [0, 0, 1, 1], [], []>} : vector<8x8xf32>, vector<8x8xf32>, vector<8x8xf32> -> vector<8x8xf32>
    %134 = vector.extract_strided_slice %8 {offsets = [8, 24], sizes = [8, 8], strides = [1, 1]} : vector<16x32xf32> to vector<8x8xf32>
    %135 = vector.extract_strided_slice %9 {offsets = [8, 24], sizes = [8, 8], strides = [1, 1]} : vector<16x32xf32> to vector<8x8xf32>
    %136 = vector.extract_strided_slice %10 {offsets = [8, 24], sizes = [8, 8], strides = [1, 1]} : vector<16x32xf32> to vector<8x8xf32>
    %cst_41 = arith.constant dense<0.000000e+00> : vector<8x8xf32>
    %137 = tpu.matmul %134, %135, %cst_41 {dimension_numbers = #tpu.dot_dimension_numbers<[1], [1], [0], [0], [0, 0, 1, 0], [], []>} : vector<8x8xf32>, vector<8x8xf32>, vector<8x8xf32> -> vector<8x8xf32>
    %cst_42 = arith.constant -1.000000e+30 : f32
    %138 = vector.broadcast %cst_42 : f32 to vector<8x8xf32>
    %139 = arith.select %13, %137, %138 : vector<8x8xi1>, vector<8x8xf32>
    %cst_43 = arith.constant dense<0xFF800000> : vector<8xf32>
    %140 = vector.multi_reduction <maximumf>, %139, %cst_43 [1] : vector<8x8xf32> to vector<8xf32>
    %141 = vector.shape_cast %140 : vector<8xf32> to vector<8x1xf32>
    %142 = vector.broadcast %141 : vector<8x1xf32> to vector<8x8xf32>
    %143 = arith.subf %139, %142 : vector<8x8xf32>
    %144 = math.exp %143 : vector<8x8xf32>
    %cst_44 = arith.constant dense<0.000000e+00> : vector<8xf32>
    %145 = vector.multi_reduction <add>, %144, %cst_44 [1] : vector<8x8xf32> to vector<8xf32>
    %146 = vector.shape_cast %145 : vector<8xf32> to vector<8x1xf32>
    %147 = tpu.reciprocal %146 {approx = true} : vector<8x1xf32> -> vector<8x1xf32>
    %148 = vector.broadcast %147 : vector<8x1xf32> to vector<8x8xf32>
    %149 = arith.mulf %144, %148 : vector<8x8xf32>
    %cst_45 = arith.constant dense<0.000000e+00> : vector<8x8xf32>
    %150 = tpu.matmul %149, %136, %cst_45 {dimension_numbers = #tpu.dot_dimension_numbers<[1], [0], [0], [1], [0, 0, 1, 1], [], []>} : vector<8x8xf32>, vector<8x8xf32>, vector<8x8xf32> -> vector<8x8xf32>
    %151 = tpu.concatenate %99, %116, %133, %150 in 1 : vector<8x8xf32>, vector<8x8xf32>, vector<8x8xf32>, vector<8x8xf32> -> vector<8x32xf32>
    %152 = tpu.concatenate %82, %151 in 0 : vector<8x32xf32>, vector<8x32xf32> -> vector<16x32xf32>
    %c0_46 = arith.constant 0 : index
    %c0_47 = arith.constant 0 : index
    %153 = vector.load %arg4[%c0_46, %c0_47] : memref<32x32xf32, #tpu.memory_space<vmem>>, vector<32x32xf32>
    %cst_48 = arith.constant dense<0.000000e+00> : vector<16x32xf32>
    %154 = tpu.matmul %152, %153, %cst_48 {dimension_numbers = #tpu.dot_dimension_numbers<[1], [0], [0], [1], [0, 0, 1, 1], [], []>} : vector<16x32xf32>, vector<32x32xf32>, vector<16x32xf32> -> vector<16x32xf32>
    %c0_49 = arith.constant 0 : index
    %c0_50 = arith.constant 0 : index
    %155 = vector.load %arg5[%c0_49, %c0_50] : memref<1x32xf32, #tpu.memory_space<vmem>>, vector<1x32xf32>
    %156 = vector.broadcast %155 : vector<1x32xf32> to vector<16x32xf32>
    %157 = arith.addf %154, %156 : vector<16x32xf32>
    %c0_51 = arith.constant 0 : index
    %c0_52 = arith.constant 0 : index
    %158 = vector.load %arg6[%c0_51, %c0_52] : memref<16x32xf32, #tpu.memory_space<vmem>>, vector<16x32xf32>
    tpu.vector_store %arg6[%c0_51, %c0_52], %157 {strides = array<i32>} : memref<16x32xf32, #tpu.memory_space<vmem>>, vector<16x32xf32>,
    return
  }
  func.func @transform_0(%arg0: i32) -> (i32, i32) {
    %c0_i32 = arith.constant 0 : i32
    %c0_i32_0 = arith.constant 0 : i32
    return %arg0, %c0_i32 : i32, i32
  }
  func.func @transform_1(%arg0: i32) -> (i32, i32) {
    %c0_i32 = arith.constant 0 : i32
    %c0_i32_0 = arith.constant 0 : i32
    %c0_i32_1 = arith.constant 0 : i32
    return %c0_i32, %c0_i32_0 : i32, i32
  }
  func.func @transform_2(%arg0: i32) -> (i32, i32) {
    %c0_i32 = arith.constant 0 : i32
    %c0_i32_0 = arith.constant 0 : i32
    %c0_i32_1 = arith.constant 0 : i32
    return %c0_i32, %c0_i32_0 : i32, i32
  }
  func.func @transform_3(%arg0: i32) -> (i32, i32) {
    %c0_i32 = arith.constant 0 : i32
    %c0_i32_0 = arith.constant 0 : i32
    %c0_i32_1 = arith.constant 0 : i32
    return %c0_i32, %c0_i32_0 : i32, i32
  }
  func.func @transform_4(%arg0: i32) -> (i32, i32) {
    %c0_i32 = arith.constant 0 : i32
    %c0_i32_0 = arith.constant 0 : i32
    %c0_i32_1 = arith.constant 0 : i32
    return %c0_i32, %c0_i32_0 : i32, i32
  }
  func.func @transform_5(%arg0: i32) -> (i32, i32) {
    %c0_i32 = arith.constant 0 : i32
    %c0_i32_0 = arith.constant 0 : i32
    return %arg0, %c0_i32 : i32, i32
  }
}

</mosaic_0001>

<bundles_post_ra>
// kernel: tpu_custom_call.1
= control target key start
LH: loop header
LB: loop body
LE: loop exit
PB: predicated region body
PF: predicated region fallthrough
CT: control target
= control target key end

     0   :  { %10 = vsyncpa [#allocation3], 0  ;;  %s2291_s0 = inlined_call_operand.hbm [shape: f32[16,32], index: 0, kind: input, shape index: {}]   ;;  %s2292_s1 = inlined_call_operand.hbm [shape: f32[32,96], index: 1, kind: input, shape index: {}]   ;;  %s2293_s2 = inlined_call_operand.vmem [shape: f32[1,96], index: 2, kind: input, shape index: {}]   ;;  %s2294_s3 = inlined_call_operand.hbm [shape: f32[32,32], index: 3, kind: input, shape index: {}]   ;;  %s2295_s4 = inlined_call_operand.vmem [shape: f32[1,32], index: 4, kind: input, shape index: {}]   ;;  %s2296_s5 = inlined_call_operand.hbm [shape: f32[16,32], index: 5, kind: output, shape index: {}]  }
   0x1   :  { %11 = vsyncpa [#allocation6], 0 }
   0x2   :  { %12 = vsyncpa [#allocation4], 0  ;;  %s1976_s18 = smov [#allocation5]   ;;  %s1977_s20 = smov [#allocation2]  }
   0x3   :  { %s30_s19 = sshll.u32 %s1976_s18, 4  ;;  %s18_s21 = sshll.u32 %s1977_s20, 4  ;;  %s31_s19 = int_to_ptr.vmem [resolvable:$true] %s30_s19  ;;  %s2027_s21 = int_to_ptr.vmem [resolvable:$true] %s18_s21 }
   0x4   :  { %s1882_s24 = scalar_lea.hbm %s2292_s1, 512 }
   0x5   :  { %p1883_p0 = scmp.ne.s32.totalorder %s2292_s1, %s1882_s24  ;;  %p1886_p1 = scmp.lt.u32.totalorder %s1882_s24, %s2292_s1 }
   0x7   :  { %p1888_p2 = pnand %p1886_p1, %p1883_p0 }
   0x9   :  { %1891 = shalt.err (!%p1888_p2)
}
   0xa   :  { %s1892_s29 = scalar_lea.vmem %s31_s19, 512  ;;  %p1897_p4 = scmp.lt.s32.totalorder %s31_s19, %s31_s19 }
   0xb   :  { %p1893_p3 = scmp.ne.s32.totalorder %s31_s19, %s1892_s29  ;;  %p1898_p5 = scmp.lt.s32.totalorder %s1892_s29, %s1892_s29 }
   0xd   :  { %p1899_p6 = por %p1898_p5, %p1897_p4 }
   0xf   :  { %p1900_p7 = pnand %p1899_p6, %p1893_p3 }
  0x11   :  { %1903 = shalt.err (!%p1900_p7)
}
  0x12   :  { %s1978_s30 = smov 128   ;;  %s1979_s6 = smov 8  }
  0x13   :  { %36 = dma.hbm_to_vmem [thread:$0]  %s2292_s1, 512, %s31_s19, [#allocation6], %s1978_s30, %s1978_s30, %s1979_s6  }
  0x14   :  { %s1904_s11 = scalar_lea.hbm %s2291_s0, 256 }
  0x15   :  { %p1905_p8 = scmp.ne.s32.totalorder %s2291_s0, %s1904_s11  ;;  %p1908_p9 = scmp.lt.u32.totalorder %s1904_s11, %s2291_s0 }
  0x17   :  { %p1910_p10 = pnand %p1908_p9, %p1905_p8 }
  0x19   :  { %1913 = shalt.err (!%p1910_p10)
}
  0x1a   :  { %s1914_s16 = scalar_lea.vmem %s2027_s21, 256  ;;  %p1919_p12 = scmp.lt.s32.totalorder %s2027_s21, %s2027_s21 }
  0x1b   :  { %p1915_p11 = scmp.ne.s32.totalorder %s2027_s21, %s1914_s16  ;;  %p1920_p13 = scmp.lt.s32.totalorder %s1914_s16, %s1914_s16 }
  0x1d   :  { %p1921_p0 = por %p1920_p13, %p1919_p12 }
  0x1f   :  { %p1922_p1 = pnand %p1921_p0, %p1915_p11 }
  0x21   :  { %1925 = shalt.err (!%p1922_p1)
}
  0x22   :  { %24 = dma.hbm_to_vmem [thread:$0]  %s2291_s0, 256, %s2027_s21, [#allocation3], %s1978_s30, %s1978_s30, %s1979_s6  }
  0x23   :  { %s1980_s18 = smov [#allocation7]   ;;  %s1926_s23 = scalar_lea.hbm %s2294_s3, 512 }
  0x24   :  { %s44_s19 = sshll.u32 %s1980_s18, 4  ;;  %p1927_p2 = scmp.ne.s32.totalorder %s2294_s3, %s1926_s23  ;;  %s45_s19 = int_to_ptr.vmem [resolvable:$true] %s44_s19 }
  0x25   :  { %p1930_p3 = scmp.lt.u32.totalorder %s1926_s23, %s2294_s3 }
  0x27   :  { %p1932_p4 = pnand %p1930_p3, %p1927_p2 }
  0x29   :  { %1935 = shalt.err (!%p1932_p4)
}
  0x2a   :  { %s1936_s28 = scalar_lea.vmem %s45_s19, 512  ;;  %p1941_p6 = scmp.lt.s32.totalorder %s45_s19, %s45_s19 }
  0x2b   :  { %p1937_p5 = scmp.ne.s32.totalorder %s45_s19, %s1936_s28  ;;  %p1942_p7 = scmp.lt.s32.totalorder %s1936_s28, %s1936_s28 }
  0x2d   :  { %p1943_p8 = por %p1942_p7, %p1941_p6 }
  0x2f   :  { %p1944_p9 = pnand %p1943_p8, %p1937_p5 }
  0x31   :  { %1947 = shalt.err (!%p1944_p9)
}
  0x32   :  { %50 = dma.hbm_to_vmem [thread:$0]  %s2294_s3, 512, %s45_s19, [#allocation6], %s1978_s30, %s1978_s30, %s1979_s6  }
  0x33   :  { %1970 = dma.done.wait [#allocation3], 256  }
  0x34   :  { %1971 = vsyncadd [#allocation3], 4294967040 }
  0x35   :  { %1972 = dma.done.wait [#allocation6], 1024  }
  0x36   :  { %1973 = vsyncadd [#allocation6], 4294966272  ;;  %vm75_vm0 = vcmask 261120   ;;  %v64_v0 = vld [vmem:[#allocation5] sm:$0xff]  ;;  %v65_v1 = vld [vmem:[#allocation5 + $0x8] sm:$0xff]  ;;  %v1981_v8 = vmov 0.0   ;;  %v159_v21 = vlaneseq }
  0x37   :  { %v66_v2 = vld [vmem:[#allocation5 + $0x10] sm:$0xff]  ;;  %v1813_v3 = vpack.c.bf16 %v65_v1, %v64_v0  ;;  %v67_v4 = vld [vmem:[#allocation5 + $0x18] sm:$0xff]  ;;  %1722 = vmatprep.subr.mxu1 %v1981_v8  ;;  %vm1982_vm1 = vmmov 0   ;;  %s1983_s7 = smov 64   ;;  %s1984_s8 = smov 96   ;;  %vm167_vm2 = vcmask 64512  }
  0x38   :  { %v62_v5 = vld [vmem:[#allocation2] sm:$0xff]  ;;  %v1817_v6 = vpack.c.bf16 %v67_v4, %v66_v2  ;;  %v63_v7 = vld [vmem:[#allocation2 + $0x8] sm:$0xff]  ;;  %1724 = vmatprep.mubr.msk.f32.mxu1 %vm1982_vm1, %v1981_v8  ;;  %s1985_s9 = smov 88   ;;  %s1987_s10 = smov 80   ;;  %v160_v22 = vshrl.u32 %v159_v21, 7  ;;  %v162_v23 = vand.u32 127, %v159_v21 }
  0x39   :  { %1719 = vmatprep.mubr.msk.f32.mxu0 %vm75_vm0, %v62_v5  ;;  %1814 = vmatprep.subr.bf16.mxu0 %v1813_v3  ;;  %v1637_v9 = vld [vmem:[%s2293_s2] ss:$0 sm:$0xff]  ;;  %s1986_s2 = smov 120   ;;  %s1988_s11 = smov 112   ;;  %vm842_vm4 = vcmask 130048   ;;  %vm844_vm5 = vcmask 195584  }
  0x3a   :  { %1816 = vmatpush3.bf16.msra.mxu0 %v1813_v3  ;;  %s1989_s12 = smov 104   ;;  %vm2121_vm3 = vcmp.ge.s32.totalorder %v160_v22, %v162_v23  ;;  %s1990_s13 = smov 72  }
  0x3b   :  { %1818 = vmatprep.subr.bf16.mxu0 %v1817_v6  ;;  %s1991_s14 = smov 48   ;;  %s1992_s15 = smov 56  }
  0x3c   :  { %s1993_s16 = smov 40   ;;  %s1994_s1 = smov 16  }
  0x3d   :  { %s1995_s17 = smov 24   ;;  %s1996_s20 = smov [#allocation8]  }
  0x3e   :  { %1820 = vmatpush3.bf16.msra.mxu0 %v1817_v6  ;;  %s1624_s22 = sshll.u32 %s1996_s20, 4  ;;  %s1625_s22 = int_to_ptr.vmem [resolvable:$true] %s1624_s22 }
  0x3f   :  { %1742 = vmatprep.subr.mxu0 %v1981_v8  ;;  %s1948_s23 = scalar_lea.vmem %s1625_s22, 256  ;;  %p1953_p11 = scmp.lt.s32.totalorder %s1625_s22, %s1625_s22 }
  0x40   :  { %p1949_p10 = scmp.ne.s32.totalorder %s1625_s22, %s1948_s23  ;;  %p1954_p12 = scmp.lt.s32.totalorder %s1948_s23, %s1948_s23 }
  0x41   :  { %1720 = vmatmul.mubr.msk.f32.vlgmr.msra.gmra.mrb[0].mxu0 %vm75_vm0, %v63_v7 }
  0x42   :  { %1744 = vmatprep.mubr.msk.f32.mxu0 %vm1982_vm1, %v1981_v8  ;;  %p1955_p13 = por %p1954_p12, %p1953_p11 }
  0x44   :  { %p1956_p0 = pnand %p1955_p13, %p1949_p10 }
 0x114   :  { %v1721_v10 = vpop.f32.mrb[0].mxu0 }
 0x115   :  { %v2090_v11 = vadd.f32 %v1721_v10, %v1637_v9  ;;  %v148_v12 = vpop.f32.mrb[1].mxu0 }
 0x116   :  { %v2092_v13 = vadd.f32 %v1637_v9, %v148_v12 }
 0x117   :  { %v158_v31 = vmul.f32 0.35355338, %v2090_v11 }
 0x118   :  { %255 = vrot.lane.b32.xlu1 %v2092_v13, %s1983_s7  ;;  %165 = vrot.lane.b32.xlu0 %v2092_v13, %s1984_s8  ;;  %v157_v14 = vmul.f32 0.35355338, %v2092_v13 }
 0x11c   :  { %333 = vrot.lane.b32.xlu1 %v2092_v13, %s1985_s9 }
 0x120   :  { %331 = vrot.lane.b32.xlu1 %v157_v14, %s1986_s2 }
 0x124   :  { %499 = vrot.lane.b32.xlu1 %v2092_v13, %s1987_s10 }
 0x128   :  { %497 = vrot.lane.b32.xlu1 %v157_v14, %s1988_s11 }
 0x12c   :  { %663 = vrot.lane.b32.xlu1 %v157_v14, %s1989_s12 }
 0x18a   :  { %v256_v15 = vpop.permute.xlu1 %255  ;;  %v166_v16 = vpop.permute.xlu0 %165 }
 0x18b   :  { %1723 = vmatpush3.xpose.msk.msra.mxu1 %vm167_vm2, %v166_v16 }
 0x18c   :  { %1727 = vmatprep.subr.mxu1 %v1981_v8 }
 0x18e   :  { %v2108_v17 = vpop.permute.xlu1 %333  ;;  %1725 = vmatmul.mubr.msk.f32.vlgmr.msra.gmra.mrb[0].mxu1 %vm167_vm2, %v157_v14 }
 0x18f   :  { %1728 = vmatpush3.msra.mxu1 %v256_v15  ;;  %1729 = vmatprep.mubr.msk.f32.mxu1 %vm1982_vm1, %v1981_v8 }
 0x190   :  { %1732 = vmatprep.subr.mxu1 %v1981_v8 }
 0x192   :  { %v2114_v18 = vpop.permute.xlu1 %331 }
 0x196   :  { %v500_v19 = vpop.permute.xlu1 %499 }
 0x197   :  { %1743 = vmatpush3.xpose.msk.msra.mxu0 %vm167_vm2, %v500_v19 }
 0x198   :  { %1752 = vmatprep.subr.mxu0 %v1981_v8 }
 0x19a   :  { %v498_v20 = vpop.permute.xlu1 %497 }
 0x19b   :  { %1745 = vmatmul.mubr.msk.f32.vlgmr.msra.gmra.mrb[2].mxu0 %vm167_vm2, %v498_v20 }
 0x19c   :  { %1754 = vmatprep.mubr.msk.f32.mxu0 %vm1982_vm1, %v1981_v8 }
 0x19e   :  { %v664_v38 = vpop.permute.xlu1 %663 }
 0x261   :  { %v239_v25 = vpop.f32.mrb[0].mxu1 }
 0x262   :  { %v243_v26 = vsel %vm2121_vm3, %v239_v25, -1e+30  ;;  %v1726_v27 = vpop.f32.mrb[1].mxu1 }
 0x263   :  { %v244_v28 = vsel %vm167_vm2, %v243_v26, -inf }
 0x264   :  { %245 = vmax.xlane.f32.xlu0 %v244_v28 }
 0x26e   :  { %v571_v29 = vpop.f32.mrb[2].mxu0 }
 0x26f   :  { %v1746_v30 = vpop.f32.mrb[3].mxu0  ;;  %v2134_v32 = vsel %vm2121_vm3, %v571_v29, -1e+30 }
 0x270   :  { %v576_v33 = vsel %vm167_vm2, %v2134_v32, -inf }
 0x27a   :  { %665 = vrot.lane.b32.xlu0 %v2092_v13, %s1990_s13 }
 0x27e   :  { %1178 = vrot.lane.b32.xlu0 %v158_v31, %s1988_s11 }
 0x282   :  { %1344 = vrot.lane.b32.xlu0 %v158_v31, %s1989_s12 }
 0x2a1   :  { %577 = vmax.xlane.f32.xlu0 %v576_v33 }
 0x2f1   :  { %v246_v34 = vpop.xlane.xlu0 %245 }
 0x2f2   :  { %v247_v35 = vsub.f32 %v243_v26, %v246_v34 }
 0x2f4   :  { %v248_v36 = vmul.f32 1.442695, %v247_v35 }
 0x2f5   :  { %v666_v37 = vpop.permute.xlu0 %665 }
 0x2f6   :  { %1850 = vpow2.f32 %v248_v36  ;;  %1753 = vmatpush3.xpose.msk.msra.mxu0 %vm167_vm2, %v666_v37 }
 0x2f7   :  { %1762 = vmatprep.subr.mxu0 %v1981_v8 }
 0x2f9   :  { %1755 = vmatmul.mubr.msk.f32.vlgmr.msra.gmra.mrb[4].mxu0 %vm167_vm2, %v664_v38  ;;  %v1179_v48 = vpop.permute.xlu0 %1178 }
 0x2fa   :  { %1764 = vmatprep.mubr.msk.f32.mxu0 %vm1982_vm1, %v1981_v8 }
 0x2fd   :  { %v1345_v50 = vpop.permute.xlu0 %1344 }
 0x300   :  { %v1851_v39 = vpop.eup %1850 }
 0x301   :  { %v250_v40 = vsel %vm167_vm2, %v1851_v39, 0.0 }
 0x302   :  { %251 = vadd.xlane.f32.xlu1 %v250_v40 }
 0x313   :  { %847 = vrot.lane.b32.xlu1 %v2090_v11, %s1984_s8 }
 0x317   :  { %1014 = vrot.lane.b32.xlu1 %v2090_v11, %s1985_s9 }
 0x31b   :  { %1012 = vrot.lane.b32.xlu1 %v158_v31, %s1986_s2 }
 0x31f   :  { %1180 = vrot.lane.b32.xlu1 %v2090_v11, %s1987_s10 }
 0x323   :  { %1346 = vrot.lane.b32.xlu1 %v2090_v11, %s1990_s13 }
 0x32e   :  { %v578_v55 = vpop.xlane.xlu0 %577 }
 0x32f   :  { %v579_v58 = vsub.f32 %v2134_v32, %v578_v55 }
 0x331   :  { %v580_v61 = vmul.f32 1.442695, %v579_v58 }
 0x38f   :  { %v252_v41 = vpop.xlane.xlu1 %251 }
 0x390   :  { %1852 = vrcp.f32 %v252_v41 }
 0x391   :  { %1854 = vpow2.f32 %v580_v61 }
 0x393   :  { %v848_v42 = vpop.permute.xlu1 %847 }
 0x394   :  { %1763 = vmatpush3.xpose.msk.msra.mxu0 %vm167_vm2, %v848_v42 }
 0x395   :  { %1772 = vmatprep.subr.mxu0 %v1981_v8 }
 0x397   :  { %v1015_v43 = vpop.permute.xlu1 %1014  ;;  %1765 = vmatmul.mubr.msk.f32.vlgmr.msra.gmra.mrb[6].mxu0 %vm167_vm2, %v158_v31 }
 0x398   :  { %1773 = vmatpush3.xpose.msk.msra.mxu0 %vm167_vm2, %v1015_v43  ;;  %1774 = vmatprep.mubr.msk.f32.mxu0 %vm1982_vm1, %v1981_v8 }
 0x399   :  { %1782 = vmatprep.subr.mxu0 %v1981_v8 }
 0x39a   :  { %v1853_v44 = vpop.eup %1852 }
 0x39b   :  { %v254_v45 = vmul.f32 %v1853_v44, %v1851_v39  ;;  %v1013_v46 = vpop.permute.xlu1 %1012  ;;  %v2199_v21 = vpop.eup %1854 }
 0x39c   :  { %1775 = vmatmul.mubr.msk.f32.vlgmr.msra.gmra.mrb[8].mxu0 %vm167_vm2, %v1013_v46  ;;  %v582_v25 = vsel %vm167_vm2, %v2199_v21, 0.0 }
 0x39d   :  { %1730 = vmatmul.mubr.msk.f32.vlgmr.msra.gmra.mrb[2].mxu1 %vm167_vm2, %v254_v45  ;;  %1784 = vmatprep.mubr.msk.f32.mxu0 %vm1982_vm1, %v1981_v8 }
 0x39e   :  { %1733 = vmatpush3.xpose.msk.msra.mxu1 %vm167_vm2, %v2108_v17  ;;  %1734 = vmatprep.mubr.msk.f32.mxu1 %vm1982_vm1, %v1981_v8 }
 0x39f   :  { %v1181_v47 = vpop.permute.xlu1 %1180  ;;  %1737 = vmatprep.subr.mxu1 %v1981_v8 }
 0x3a0   :  { %1783 = vmatpush3.xpose.msk.msra.mxu0 %vm167_vm2, %v1181_v47 }
 0x3a1   :  { %1735 = vmatmul.mubr.msk.f32.vlgmr.msra.gmra.mrb[4].mxu1 %vm167_vm2, %v2114_v18  ;;  %1792 = vmatprep.subr.mxu0 %v1981_v8 }
 0x3a2   :  { %1739 = vmatprep.mubr.msk.f32.mxu1 %vm1982_vm1, %v1981_v8 }
 0x3a3   :  { %v1347_v49 = vpop.permute.xlu1 %1346  ;;  %1785 = vmatmul.mubr.msk.f32.vlgmr.msra.gmra.mrb[10].mxu0 %vm167_vm2, %v1179_v48 }
 0x3a4   :  { %1793 = vmatpush3.xpose.msk.msra.mxu0 %vm167_vm2, %v1347_v49  ;;  %1794 = vmatprep.mubr.msk.f32.mxu0 %vm1982_vm1, %v1981_v8 }
 0x3a7   :  { %1795 = vmatmul.mubr.msk.f32.vlgmr.msra.gmra.mrb[12].mxu0 %vm167_vm2, %v1345_v50 }
 0x3cc   :  { %v737_v51 = vpop.f32.mrb[4].mxu0 }
 0x3cd   :  { %v741_v52 = vsel %vm2121_vm3, %v737_v51, -1e+30  ;;  %v1756_v53 = vpop.f32.mrb[5].mxu0 }
 0x3ce   :  { %v742_v54 = vsel %vm167_vm2, %v741_v52, -inf }
 0x3cf   :  { %743 = vmax.xlane.f32.xlu0 %v742_v54 }
 0x45c   :  { %v744_v56 = vpop.xlane.xlu0 %743 }
 0x45d   :  { %v745_v60 = vsub.f32 %v741_v52, %v744_v56 }
 0x45f   :  { %v746_v2 = vmul.f32 1.442695, %v745_v60 }
 0x461   :  { %1856 = vpow2.f32 %v746_v2 }
 0x46a   :  { %v920_v57 = vpop.f32.mrb[6].mxu0 }
 0x46b   :  { %v1766_v59 = vpop.f32.mrb[7].mxu0  ;;  %v924_v12 = vsel %vm2121_vm3, %v920_v57, -1e+30  ;;  %v2202_v23 = vpop.eup %1856 }
 0x46c   :  { %v925_v16 = vsel %vm167_vm2, %v924_v12, -inf  ;;  %v748_v24 = vsel %vm167_vm2, %v2202_v23, 0.0 }
 0x46f   :  { %v1086_v62 = vpop.f32.mrb[8].mxu0 }
 0x470   :  { %v1090_v63 = vsel %vm2121_vm3, %v1086_v62, -1e+30  ;;  %v2185_v0 = vpop.f32.mrb[2].mxu1  ;;  %v1776_v1 = vpop.f32.mrb[9].mxu0 }
 0x471   :  { %v1731_v3 = vpop.f32.mrb[3].mxu1  ;;  %v1091_v4 = vsel %vm167_vm2, %v1090_v63, -inf }
 0x472   :  { %1092 = vmax.xlane.f32.xlu0 %v1091_v4 }
 0x474   :  { %v405_v5 = vpop.f32.mrb[4].mxu1 }
 0x475   :  { %v409_v6 = vsel %vm2121_vm3, %v405_v5, -1e+30  ;;  %v1736_v7 = vpop.f32.mrb[5].mxu1 }
 0x476   :  { %v1252_v9 = vpop.f32.mrb[10].mxu0  ;;  %v410_v10 = vsel %vm167_vm2, %v409_v6, -inf }
 0x477   :  { %v1786_v14 = vpop.f32.mrb[11].mxu0  ;;  %411 = vmax.xlane.f32.xlu1 %v410_v10  ;;  %v1256_v17 = vsel %vm2121_vm3, %v1252_v9, -1e+30 }
 0x478   :  { %v1257_v22 = vsel %vm167_vm2, %v1256_v17, -inf }
 0x47a   :  { %v1418_v15 = vpop.f32.mrb[12].mxu0 }
 0x47b   :  { %v1422_v18 = vsel %vm2121_vm3, %v1418_v15, -1e+30  ;;  %v1796_v19 = vpop.f32.mrb[13].mxu0  ;;  %926 = vmax.xlane.f32.xlu1 %v925_v16 }
 0x47c   :  { %v1423_v20 = vsel %vm167_vm2, %v1422_v18, -inf  ;;  %v1525_v19 = vld [vmem:[#allocation7] sm:$0xff] }
 0x47d   :  { %1424 = vmax.xlane.f32.xlu0 %v1423_v20  ;;  %v1526_v20 = vld [vmem:[#allocation7 + $0x8] sm:$0xff] }
 0x47f   :  { %1258 = vmax.xlane.f32.xlu1 %v1257_v22  ;;  %v1821_v22 = vpack.c.bf16 %v1526_v20, %v1525_v19 }
 0x481   :  { %583 = vadd.xlane.f32.xlu0 %v582_v25  ;;  %1822 = vmatprep.subr.bf16.mxu0 %v1821_v22  ;;  %v1527_v25 = vld [vmem:[#allocation7 + $0x10] sm:$0xff] }
 0x482   :  { %1824 = vmatpush3.bf16.msra.mxu0 %v1821_v22 }
 0x483   :  { %749 = vadd.xlane.f32.xlu1 %v748_v24  ;;  %v1528_v24 = vld [vmem:[#allocation7 + $0x18] sm:$0xff] }
 0x4ff   :  { %v1093_v26 = vpop.xlane.xlu0 %1092 }
 0x500   :  { %v1094_v27 = vsub.f32 %v1090_v63, %v1093_v26  ;;  %v1825_v26 = vpack.c.bf16 %v1528_v24, %v1527_v25 }
 0x502   :  { %v1095_v28 = vmul.f32 1.442695, %v1094_v27  ;;  %1826 = vmatprep.subr.bf16.mxu0 %v1825_v26 }
 0x503   :  { %1828 = vmatpush3.bf16.msra.mxu0 %v1825_v26 }
 0x504   :  { %1858 = vpow2.f32 %v1095_v28  ;;  %v412_v29 = vpop.xlane.xlu1 %411 }
 0x505   :  { %v413_v47 = vsub.f32 %v409_v6, %v412_v29 }
 0x507   :  { %v414_v48 = vmul.f32 1.442695, %v413_v47 }
 0x508   :  { %v927_v30 = vpop.xlane.xlu1 %926 }
 0x509   :  { %v928_v31 = vsub.f32 %v924_v12, %v927_v30 }
 0x50a   :  { %v1425_v32 = vpop.xlane.xlu0 %1424 }
 0x50b   :  { %v929_v33 = vmul.f32 1.442695, %v928_v31  ;;  %v1426_v34 = vsub.f32 %v1422_v18, %v1425_v32 }
 0x50c   :  { %v1259_v35 = vpop.xlane.xlu1 %1258 }
 0x50d   :  { %1860 = vpow2.f32 %v929_v33  ;;  %v1427_v36 = vmul.f32 1.442695, %v1426_v34  ;;  %v1260_v37 = vsub.f32 %v1256_v17, %v1259_v35 }
 0x50e   :  { %v2208_v38 = vpop.eup %1858  ;;  %v584_v51 = vpop.xlane.xlu0 %583 }
 0x50f   :  { %1862 = vpow2.f32 %v1427_v36  ;;  %v1261_v39 = vmul.f32 1.442695, %v1260_v37  ;;  %v1097_v40 = vsel %vm167_vm2, %v2208_v38, 0.0 }
 0x510   :  { %1098 = vadd.xlane.f32.xlu1 %v1097_v40  ;;  %v750_v55 = vpop.xlane.xlu1 %749 }
 0x511   :  { %1864 = vpow2.f32 %v1261_v39 }
 0x512   :  { %1866 = vpow2.f32 %v414_v48  ;;  %v1664_v48 = vld [vmem:[%s2295_s4] ss:$0 sm:$0xff] }
 0x517   :  { %v2212_v41 = vpop.eup %1860 }
 0x518   :  { %v931_v42 = vsel %vm167_vm2, %v2212_v41, 0.0 }
 0x519   :  { %v2216_v43 = vpop.eup %1862  ;;  %932 = vadd.xlane.f32.xlu0 %v931_v42 }
 0x51a   :  { %v1429_v44 = vsel %vm167_vm2, %v2216_v43, 0.0 }
 0x51b   :  { %v2220_v45 = vpop.eup %1864  ;;  %1430 = vadd.xlane.f32.xlu1 %v1429_v44 }
 0x51c   :  { %v1263_v46 = vsel %vm167_vm2, %v2220_v45, 0.0  ;;  %v1867_v49 = vpop.eup %1866 }
 0x51d   :  { %1264 = vadd.xlane.f32.xlu0 %v1263_v46  ;;  %v416_v50 = vsel %vm167_vm2, %v1867_v49, 0.0 }
 0x52c   :  { %587 = vrot.lane.b32.xlu1 %v2092_v13, %s1991_s14 }
 0x533   :  { %421 = vrot.lane.b32.xlu0 %v2092_v13, %s1992_s15 }
 0x537   :  { %936 = vrot.lane.b32.xlu0 %v2090_v11, %s1983_s7 }
 0x53b   :  { %1268 = vrot.lane.b32.xlu0 %v2090_v11, %s1991_s14 }
 0x550   :  { %417 = vadd.xlane.f32.xlu1 %v416_v50 }
 0x561   :  { %753 = vrot.lane.b32.xlu1 %v2092_v13, %s1993_s16 }
 0x565   :  { %1102 = vrot.lane.b32.xlu1 %v2090_v11, %s1992_s15 }
 0x569   :  { %1434 = vrot.lane.b32.xlu1 %v2090_v11, %s1993_s16 }
 0x59d   :  { %v1099_v56 = vpop.xlane.xlu1 %1098 }
 0x5a6   :  { %v933_v52 = vpop.xlane.xlu0 %932 }
 0x5a8   :  { %v1431_v57 = vpop.xlane.xlu1 %1430 }
 0x5aa   :  { %v1265_v53 = vpop.xlane.xlu0 %1264 }
 0x5ac   :  { %v588_v58 = vpop.permute.xlu1 %587 }
 0x5ae   :  { %v422_v54 = vpop.permute.xlu0 %421 }
 0x5af   :  { %1738 = vmatpush3.msra.mxu1 %v422_v54 }
 0x5b0   :  { %1747 = vmatprep.subr.mxu1 %v1981_v8 }
 0x5b2   :  { %v937_v3 = vpop.permute.xlu0 %936 }
 0x5b6   :  { %v1269_v10 = vpop.permute.xlu0 %1268 }
 0x5dd   :  { %v418_v59 = vpop.xlane.xlu1 %417 }
 0x5de   :  { %1868 = vrcp.f32 %v418_v59 }
 0x5df   :  { %1870 = vrcp.f32 %v584_v51 }
 0x5e0   :  { %1872 = vrcp.f32 %v750_v55 }
 0x5e1   :  { %1874 = vrcp.f32 %v933_v52  ;;  %v754_v63 = vpop.permute.xlu1 %753 }
 0x5e2   :  { %1876 = vrcp.f32 %v1099_v56 }
 0x5e3   :  { %1878 = vrcp.f32 %v1265_v53 }
 0x5e4   :  { %1880 = vrcp.f32 %v1431_v57 }
 0x5e5   :  { %v1103_v6 = vpop.permute.xlu1 %1102 }
 0x5e8   :  { %v1869_v13 = vpop.eup %1868 }
 0x5e9   :  { %v420_v60 = vmul.f32 %v1869_v13, %v1867_v49  ;;  %v1871_v61 = vpop.eup %1870  ;;  %v1435_v15 = vpop.permute.xlu1 %1434 }
 0x5ea   :  { %v586_v11 = vmul.f32 %v1871_v61, %v2199_v21  ;;  %v1873_v62 = vpop.eup %1872 }
 0x5eb   :  { %1740 = vmatmul.mubr.msk.f32.vlgmr.msra.gmra.mrb[6].mxu1 %vm167_vm2, %v420_v60  ;;  %v752_v1 = vmul.f32 %v1873_v62, %v2202_v23  ;;  %v1875_v2 = vpop.eup %1874 }
 0x5ec   :  { %1748 = vmatpush3.msra.mxu1 %v588_v58  ;;  %1749 = vmatprep.mubr.msk.f32.mxu1 %vm1982_vm1, %v1981_v8  ;;  %v935_v4 = vmul.f32 %v1875_v2, %v2212_v41  ;;  %v1877_v5 = vpop.eup %1876 }
 0x5ed   :  { %1757 = vmatprep.subr.mxu1 %v1981_v8  ;;  %v1101_v7 = vmul.f32 %v1877_v5, %v2208_v38  ;;  %v1879_v9 = vpop.eup %1878 }
 0x5ee   :  { %v1267_v12 = vmul.f32 %v1879_v9, %v2220_v45  ;;  %v1881_v14 = vpop.eup %1880 }
 0x5ef   :  { %1750 = vmatmul.mubr.msk.f32.vlgmr.msra.gmra.mrb[8].mxu1 %vm167_vm2, %v586_v11  ;;  %v1433_v16 = vmul.f32 %v1881_v14, %v2216_v43 }
 0x5f0   :  { %1758 = vmatpush3.msra.mxu1 %v754_v63  ;;  %1759 = vmatprep.mubr.msk.f32.mxu1 %vm1982_vm1, %v1981_v8 }
 0x5f1   :  { %1767 = vmatprep.subr.mxu1 %v1981_v8 }
 0x5f3   :  { %1760 = vmatmul.mubr.msk.f32.vlgmr.msra.gmra.mrb[10].mxu1 %vm167_vm2, %v752_v1 }
 0x5f4   :  { %1768 = vmatpush3.msra.mxu1 %v937_v3  ;;  %1769 = vmatprep.mubr.msk.f32.mxu1 %vm1982_vm1, %v1981_v8 }
 0x5f5   :  { %1777 = vmatprep.subr.mxu1 %v1981_v8 }
 0x5f7   :  { %1770 = vmatmul.mubr.msk.f32.vlgmr.msra.gmra.mrb[12].mxu1 %vm167_vm2, %v935_v4 }
 0x5f8   :  { %1778 = vmatpush3.msra.mxu1 %v1103_v6  ;;  %1779 = vmatprep.mubr.msk.f32.mxu1 %vm1982_vm1, %v1981_v8 }
 0x5f9   :  { %1787 = vmatprep.subr.mxu1 %v1981_v8 }
 0x5fb   :  { %1780 = vmatmul.mubr.msk.f32.vlgmr.msra.gmra.mrb[14].mxu1 %vm167_vm2, %v1101_v7 }
 0x5fc   :  { %1788 = vmatpush3.msra.mxu1 %v1269_v10  ;;  %1789 = vmatprep.mubr.msk.f32.mxu1 %vm1982_vm1, %v1981_v8 }
 0x5fd   :  { %1797 = vmatprep.subr.mxu1 %v1981_v8 }
 0x5ff   :  { %1790 = vmatmul.mubr.msk.f32.vlgmr.msra.gmra.mrb[16].mxu1 %vm167_vm2, %v1267_v12 }
 0x600   :  { %1798 = vmatpush3.msra.mxu1 %v1435_v15  ;;  %1799 = vmatprep.mubr.msk.f32.mxu1 %vm1982_vm1, %v1981_v8 }
 0x603   :  { %1800 = vmatmul.mubr.msk.f32.vlgmr.msra.gmra.mrb[18].mxu1 %vm167_vm2, %v1433_v16 }
 0x6be   :  { %v493_v17 = vpop.f32.mrb[6].mxu1 }
 0x6bf   :  { %830 = vrot.lane.b32.xlu0 %v493_v17, %s1979_s6  ;;  %v1741_v18 = vpop.f32.mrb[7].mxu1 }
 0x6c2   :  { %v659_v21 = vpop.f32.mrb[8].mxu1 }
 0x6c3   :  { %834 = vrot.lane.b32.xlu1 %v659_v21, %s1994_s1  ;;  %v1751_v23 = vpop.f32.mrb[9].mxu1 }
 0x6c6   :  { %v825_v8 = vpop.f32.mrb[10].mxu1 }
 0x6c7   :  { %838 = vrot.lane.b32.xlu1 %v825_v8, %s1995_s17  ;;  %v1761_v27 = vpop.f32.mrb[11].mxu1 }
 0x6ca   :  { %v1008_v28 = vpop.f32.mrb[12].mxu1 }
 0x6cb   :  { %v1771_v29 = vpop.f32.mrb[13].mxu1 }
 0x6ce   :  { %v1174_v30 = vpop.f32.mrb[14].mxu1 }
 0x6cf   :  { %1511 = vrot.lane.b32.xlu0 %v1174_v30, %s1979_s6  ;;  %v1781_v31 = vpop.f32.mrb[15].mxu1 }
 0x6d2   :  { %v1340_v32 = vpop.f32.mrb[16].mxu1 }
 0x6d3   :  { %1515 = vrot.lane.b32.xlu0 %v1340_v32, %s1994_s1  ;;  %v1791_v33 = vpop.f32.mrb[17].mxu1 }
 0x6d6   :  { %v1506_v34 = vpop.f32.mrb[18].mxu1 }
 0x6d7   :  { %1519 = vrot.lane.b32.xlu1 %v1506_v34, %s1995_s17  ;;  %v1801_v35 = vpop.f32.mrb[19].mxu1 }
 0x731   :  { %v831_v36 = vpop.permute.xlu0 %830 }
 0x732   :  { %v841_v38 = vsel %vm167_vm2, %v2185_v0, %v831_v36 }
 0x735   :  { %v835_v37 = vpop.permute.xlu1 %834 }
 0x736   :  { %v843_v39 = vsel %vm842_vm4, %v841_v38, %v835_v37 }
 0x739   :  { %v839_v40 = vpop.permute.xlu1 %838 }
 0x73a   :  { %v845_v41 = vsel %vm844_vm5, %v843_v39, %v839_v40 }
 0x73b   :  { %1810 = vmatprep.mubr.msk.f32.mxu0 %vm75_vm0, %v845_v41 }
 0x741   :  { %v1512_v42 = vpop.permute.xlu0 %1511 }
 0x742   :  { %v1522_v44 = vsel %vm167_vm2, %v1008_v28, %v1512_v42 }
 0x745   :  { %v1516_v43 = vpop.permute.xlu0 %1515 }
 0x746   :  { %v1523_v45 = vsel %vm842_vm4, %v1522_v44, %v1516_v43 }
 0x749   :  { %v1520_v46 = vpop.permute.xlu1 %1519 }
 0x74a   :  { %v1524_v47 = vsel %vm844_vm5, %v1523_v45, %v1520_v46 }
 0x74b   :  { %1811 = vmatmul.mubr.msk.f32.vlgmr.msra.gmra.mrb[14].mxu0 %vm75_vm0, %v1524_v47 }
 0x81e   :  { %v1812_v0 = vpop.f32.mrb[14].mxu0 }
 0x81f   :  { %v1614_v49 = vadd.f32 %v1812_v0, %v1664_v48  ;;  %v1608_v50 = vpop.f32.mrb[15].mxu0 }
 0x820   :  { %v1609_v51 = vadd.f32 %v1664_v48, %v1608_v50 }
 0x821   :  { %1618 = vst.msk [vmem:[#allocation8 + $0x8] sm:$0xff] %vm75_vm0, %v1614_v49 }
 0x822   :  { %1617 = vst.msk [vmem:[#allocation8] sm:$0xff] %vm75_vm0, %v1609_v51 }
 0x823   :  { %1959 = shalt.err (!%p1956_p0)
}
 0x824   :  { %s1960_s25 = scalar_lea.hbm %s2296_s5, 256 }
 0x825   :  { %p1961_p1 = scmp.ne.s32.totalorder %s2296_s5, %s1960_s25  ;;  %p1964_p2 = scmp.lt.u32.totalorder %s1960_s25, %s2296_s5 }
 0x827   :  { %p1966_p3 = pnand %p1964_p2, %p1961_p1 }
 0x829   :  { %1969 = shalt.err (!%p1966_p3)
}
 0x82a   :  { %1630 = dma.vmem_to_hbm [thread:$0]  %s1625_s22, 256, %s2296_s5, [#allocation4], %s1978_s30, %s1978_s30, %s1979_s6  }
 0x82b   :  { %1974 = dma.done.wait [#allocation4], 256  }
 0x82c   :  { %1975 = vsyncadd [#allocation4], 4294967040 }
 0x82d   :  { %1634 = vsyncpa [#allocation3], 1 }
 0x82e   :  { %1635 = vsyncpa [#allocation6], 1 }
 0x82f   :  { %1636 = vsyncpa [#allocation4], 1 }

</bundles_post_ra>
